<compile_context>
chip_gen: v6e
topology: v6e:2x2x1
jax: 0.10.0
libtpu: 0.0.40
codegen_flags: <defaults>
</compile_context>

<pallas_src>
import jax
import jax.numpy as jnp
from jax.experimental import pallas as pl
from jax.experimental.pallas import tpu as pltpu


def _softmax_kernel(x_ref, o_ref):
    x = x_ref[...].astype(jnp.float32)
    m = jnp.max(x, axis=-1, keepdims=True)
    e = jnp.exp(x - m)
    s = jnp.sum(e, axis=-1, keepdims=True)
    # Exact normalization (torch parity); cost is hidden under the HBM DMA.
    o_ref[...] = (e / s).astype(o_ref.dtype)


def _sublane_multiple(dtype) -> int:
    """Minimum sublane multiple for an unmasked packed-tile layout."""
    itemsize = jnp.dtype(dtype).itemsize
    if itemsize >= 4:
        return 8
    if itemsize == 2:
        return 16
    return 32


def _pick_row_block(rows: int, d: int, dtype, row_block_cap: int) -> int:
    """Pick the row-block size for the (rows, d) softmax.

    Constraints / preferences:
      * multiple of the dtype-aware sublane count (8 / 16 / 32)
      * per-step VMEM footprint (double-buffered in + out tiles plus the f32
        intermediates feeding the max/sum reductions) stays within ~24 MiB
      * prefer a tail-free grid with an even number of blocks >= 4 so the
        pipeline overlaps and v7x's two TensorCores balance
    """
    sub = _sublane_multiple(dtype)
    io_bytes = jnp.dtype(dtype).itemsize

    # Per-row in-flight bytes: 2x double-buffered input tile, 2x double-buffered
    # output tile, plus ~2 f32 intermediates (x32 and e) materialized in VMEM.
    per_row_bytes = 2 * d * io_bytes + 2 * d * io_bytes + 2 * d * 4
    vmem_budget = 24 * 1024 * 1024  # under the explicit 32 MiB limit below
    max_rb_by_vmem = max(sub, (vmem_budget // per_row_bytes) // sub * sub)

    rb_cap = min(row_block_cap, max_rb_by_vmem)
    rb_cap = max(sub, (rb_cap // sub) * sub)

    # Prefer the largest tail-free block giving an even grid with >= 4 steps.
    if rows % sub == 0:
        for cand in range(min(rb_cap, rows), sub - 1, -sub):
            if rows % cand:
                continue
            nblocks = rows // cand
            if nblocks >= 4 and nblocks % 2 == 0:
                return cand

    # Fallback: biggest block that fits (partial last block is fine: softmax is
    # row-independent, so the garbage OOB rows of the last tile never leak).
    rows_padded = max(sub, ((rows + sub - 1) // sub) * sub)
    return max(sub, min(rb_cap, rows_padded))


def softmax_last_dim(x, *, row_block=1024):
    """Softmax over the last axis of x (any leading dims), via a Pallas kernel."""
    orig_shape = x.shape
    d = orig_shape[-1]
    rows = 1
    for s in orig_shape[:-1]:
        rows *= s
    x2 = x.reshape(rows, d)

    rb = _pick_row_block(rows, d, x.dtype, row_block)
    grid = (pl.cdiv(rows, rb),)

    out = pl.pallas_call(
        _softmax_kernel,
        out_shape=jax.ShapeDtypeStruct((rows, d), x.dtype),
        grid_spec=pltpu.PrefetchScalarGridSpec(
            num_scalar_prefetch=0,
            grid=grid,
            in_specs=[pl.BlockSpec((rb, d), lambda i: (i, 0))],
            out_specs=pl.BlockSpec((rb, d), lambda i: (i, 0)),
        ),
        compiler_params=pltpu.CompilerParams(
            dimension_semantics=("parallel",),   # shards blocks over v7x's 2 TCs
            vmem_limit_bytes=32 * 1024 * 1024,   # safe on v5e/v6e/v7x
        ),
    )(x2)
    return out.reshape(orig_shape)


# TODO(synk): if this softmax is the attention-score softmax inside a larger
# attention block, fuse it into the QK^T / PV matmuls (flash-attention style)
# instead of paying a full HBM round-trip of the [B,H,S,S] score tensor here.


if __name__ == "__main__":
    key = jax.random.PRNGKey(0)
    # Module forward: softmax(x, dim=-1) on a [1, 12, 384, 384] tensor.
    # Use a smaller-but-consistent shape for the test (rows=512, D=384).
    x = jax.random.normal(key, (1, 4, 128, 384), dtype=jnp.float32)

    y = softmax_last_dim(x)
    y = jax.block_until_ready(y)

    # Exact-reciprocal normalization -> tight tolerance vs. pure-JAX reference.
    y_ref = jax.nn.softmax(x, axis=-1)
    assert jnp.allclose(y, y_ref, atol=1e-5, rtol=1e-5), "mismatch vs reference"
    # Rows should sum to ~1 like torch.nn.functional.softmax.
    assert jnp.allclose(jnp.sum(y, axis=-1), 1.0, atol=1e-5), "rows do not sum to 1"
    print("KERNEL_OK")
</pallas_src>

<mosaic_0001>
module attributes {stable_mosaic.version = 11 : i64} {
  func.func @_softmax_kernel(%arg0: i32, %arg1: memref<128x384xf32, #tpu.memory_space<vmem>>, %arg2: memref<128x384xf32, #tpu.memory_space<vmem>>) attributes {dimension_semantics = [#tpu.dimension_semantics<parallel>], iteration_bounds = array<i64: 4>, scalar_prefetch = 0 : i64, scratch_operands = 0 : i64, tpu.core_type = #tpu.core_type<tc>, window_params = [{transform_indices = @transform_0, window_bounds = array<i64: 128, 384>}, {transform_indices = @transform_1, window_bounds = array<i64: 128, 384>}]} {
    %c0 = arith.constant 0 : index
    %c0_0 = arith.constant 0 : index
    %0 = vector.load %arg1[%c0, %c0_0] : memref<128x384xf32, #tpu.memory_space<vmem>>, vector<128x384xf32>
    %cst = arith.constant dense<0xFF800000> : vector<128xf32>
    %1 = vector.multi_reduction <maximumf>, %0, %cst [1] : vector<128x384xf32> to vector<128xf32>
    %2 = vector.shape_cast %1 : vector<128xf32> to vector<128x1xf32>
    %3 = vector.broadcast %2 : vector<128x1xf32> to vector<128x384xf32>
    %4 = arith.subf %0, %3 : vector<128x384xf32>
    %5 = math.exp %4 : vector<128x384xf32>
    %cst_1 = arith.constant dense<0.000000e+00> : vector<128xf32>
    %6 = vector.multi_reduction <add>, %5, %cst_1 [1] : vector<128x384xf32> to vector<128xf32>
    %7 = vector.shape_cast %6 : vector<128xf32> to vector<128x1xf32>
    %8 = vector.broadcast %7 : vector<128x1xf32> to vector<128x384xf32>
    %9 = arith.divf %5, %8 : vector<128x384xf32>
    %c0_2 = arith.constant 0 : index
    %c0_3 = arith.constant 0 : index
    %10 = vector.load %arg2[%c0_2, %c0_3] : memref<128x384xf32, #tpu.memory_space<vmem>>, vector<128x384xf32>
    tpu.vector_store %arg2[%c0_2, %c0_3], %9 {strides = array<i32>} : memref<128x384xf32, #tpu.memory_space<vmem>>, vector<128x384xf32>,
    return
  }
  func.func @transform_0(%arg0: i32) -> (i32, i32) {
    %c0_i32 = arith.constant 0 : i32
    %c0_i32_0 = arith.constant 0 : i32
    return %arg0, %c0_i32 : i32, i32
  }
  func.func @transform_1(%arg0: i32) -> (i32, i32) {
    %c0_i32 = arith.constant 0 : i32
    %c0_i32_0 = arith.constant 0 : i32
    return %arg0, %c0_i32 : i32, i32
  }
}

</mosaic_0001>

<bundles_post_ra>
// kernel: tpu_custom_call.1
= control target key start
LH: loop header
LB: loop body
LE: loop exit
PB: predicated region body
PF: predicated region fallthrough
CT: control target
= control target key end

     0   :  { %6 = vsyncpa [#allocation3], 0  ;;  %s1597_s0 = inlined_call_operand.hbm [shape: f32[512,384], index: 0, kind: input, shape index: {}]   ;;  %s1598_s1 = inlined_call_operand.hbm [shape: f32[512,384], index: 1, kind: output, shape index: {}]  }
   0x1   :  { %8 = vsyncpa [#allocation3 + $0x1], 0 }
   0x2   :  { %9 = vsyncpa [#allocation4], 0 }
   0x3   :  { %11 = vsyncpa [#allocation4 + $0x1], 0  ;;  %s962_s6 = smov 0   ;;  %s964_s7 = smov 0  }
   0x4   :  { %s966_s8 = smov 0   ;;  %s968_s9 = smov 0  }
   0x5 LB: > { %s983_s10 = sadd.s32 4294967295, %s944_s9   ;;  %s658_s11 = sadd.s32 4294967294, %s944_s9   ;;  %s944_s9 = sphi %s968_s9, %s1611_s9   ;;  %s940_s8 = sphi %s966_s8, %s1610_s8   ;;  %s936_s7 = sphi %s964_s7, %s1609_s7   ;;  %s932_s6 = sphi %s962_s6, %s1608_s6  }
   0x6   : > { %s987_s12 = sadd.s32 1, %s944_s9   ;;  %s24_s13 = sadd.s32 1, %s940_s8 }
   0x7   : > { %s21_s14 = ssub.s32 %s944_s9, %s987_s12  ;;  %p31_p0 = scmp.ne.s32.totalorder %s940_s8, %s936_s7 }
   0x8   : > { %p22_p1 = scmp.eq.s32.totalorder %s21_s14, 0  ;;  %p32_p2 = scmp.eq.s32.totalorder %s944_s9, 0 }
   0x9   : > { %p37_p3 = scmp.ne.s32.totalorder %s936_s7, %s932_s6  ;;  %p38_p4 = scmp.eq.s32.totalorder %s983_s10, 0 }
   0xa   : > { %s999_s15 = scalar_select %p22_p1, %s940_s8, %s24_s13  }
   0xb   : > { %p33_p5 = por %p32_p2, %p31_p0  ;;  %p1001_p6 = por %p38_p4, %p37_p3 }
   0xc   : > { %p61_p7 = scmp.eq.s32.totalorder %s983_s10, 3  ;;  %p67_p8 = scmp.eq.s32.totalorder %s658_s11, 3 }
   0xd   : > { %s1601_s16 = scalar_select %p1001_p6, 1, 0 }
   0xe   : > { %p686_p9 = scmp.lt.s32.totalorder %s944_s9, 4  ;;  %p1007_p10 = por %p61_p7, %p31_p0 }
   0xf   : > { %p1011_p11 = por %p67_p8, %p37_p3  ;;  %s87_s19 = sand.u32 1, %s940_s8  }
  0x10   : > { %s1602_s17 = scalar_select %p1007_p10, 1, 0 }
  0x11   : > { %s1603_s18 = scalar_select %p1011_p11, 1, 0 }
  0x12   : > { %s671_s20 = smul.u32 6144, %s944_s9  ;;  %p1022_p12 = pnand %p686_p9, %p33_p5 }
  0x13   : > { %s670_s21 = smul.u32 384, %s87_s19  ;;  %s1028_s28 = scalar_lea.sflag [#allocation3], %s87_s19 }
  0x14   : > { %s1020_s24 = scalar_lea.hbm %s1597_s0, %s671_s20  ;;  %p854_p0 = pneg %p1022_p12 }
  0x15   : > { %s91_s26 = scalar_lea.vmem [#allocation2], %s670_s21  ;;  %s852_s29 = scalar_lea.hbm %s1020_s24, 6144 }
  0x16   : > { %s99_s27 = sshll.u32 %s91_s26, 4  ;;  %p853_p13 = scmp.ne.s32.totalorder %s1020_s24, %s852_s29  ;;  %s1026_s27 = int_to_ptr.vmem [resolvable:$true] %s99_s27 }
  0x17   : > { %s857_s3 = scalar_lea.hbm %s1597_s0, 24576  ;;  %p858_p3 = scmp.lt.s32.totalorder %s1020_s24, %s1597_s0 }
  0x18   : > { %p855_p1 = pnand %p854_p0, %p853_p13  ;;  %p859_p4 = scmp.lt.s32.totalorder %s857_s3, %s852_s29 }
  0x1a   : > { %p856_p2 = pneg %p855_p1  ;;  %p860_p5 = por %p859_p4, %p858_p3 }
  0x1c   : > { %p861_p7 = pnand %p860_p5, %p856_p2 }
  0x1e   : > { %864 = shalt.err (!%p861_p7)
}
  0x1f   : > { %s865_s11 = scalar_lea.vmem %s1026_s27, 6144  ;;  %s946_s13 = smov [#allocation2]  }
  0x20   : > { %p866_p8 = scmp.ne.s32.totalorder %s1026_s27, %s865_s11  ;;  %s870_s14 = sshll.u32 %s946_s13, 4  ;;  %s871_s14 = int_to_ptr.vmem [resolvable:$false] %s870_s14 }
  0x21   : > { %s872_s19 = scalar_lea.vmem %s871_s14, 12288  ;;  %p873_p1 = scmp.lt.s32.totalorder %s1026_s27, %s871_s14 }
  0x22   : > { %p868_p9 = pnand %p866_p8, %p854_p0  ;;  %p874_p11 = scmp.lt.s32.totalorder %s872_s19, %s865_s11 }
  0x24   : > { %p869_p13 = pneg %p868_p9  ;;  %p875_p10 = por %p874_p11, %p873_p1 }
  0x26   : > { %p876_p6 = pnand %p875_p10, %p869_p13 }
  0x28   : > { %879 = shalt.err (!%p876_p6)
}
  0x29   : > { %s947_s20 = smov 384   ;;  %s948_s21 = smov 24  }
  0x2a   : > { %681 = dma.hbm_to_vmem [thread:$0]  (!%p1022_p12), %s1020_s24, 6144, %s1026_s27, %s1028_s28, %s947_s20, %s947_s20, %s948_s21  }
  0x2b   : > { %p664_p0 = scmp.ge.s32.totalorder %s944_s9, 1  ;;  %p107_p2 = scmp.lt.s32.totalorder %s944_s9, 5 }
  0x2d   : > { %p108_p3 = pnand %p664_p0, %p107_p2 }
  0x2e   : > { %s1052_s22 = sand.u32 (!%p108_p3), 1, %s936_s7   ;;  %p1605_p6 = scmp.ne.s32.totalorder (!%p108_p3), %s1601_s16, 0 }
  0x2f   : > { %111 = sbr.rel (%p108_p3) target bundleno = 433 (0x1b1), region = 24  ;;  %s114_s26 = scalar_lea.sflag (!%p108_p3), [#allocation3], %s1052_s22 }
  0x30   : > { %s672_s23 = smul.u32 (!%p108_p3), 384, %s1052_s22 }
  0x32   : > { %s1058_s29 = scalar_lea.vmem (!%p108_p3), [#allocation2], %s672_s23 }
  0x34   : > { %923 = dma.done.wait (%p1605_p6), %s114_s26, 6144  }
  0x35   : > { %925 = vsyncadd (%p1605_p6), %s114_s26, 4294961152  ;;  %v1065_v0 = vld [vmem:[%s1058_s29] sm:$0xff]  ;;  %v1068_v1 = vld [vmem:[%s1058_s29 + $0x8] sm:$0xff]  ;;  %s1453_s16 = scalar_lea.vmem [#allocation5], %s672_s23  ;;  %s673_s24 = smul.u32 6144, %s983_s10 }
  0x36   : > { %v1071_v2 = vld [vmem:[%s1058_s29 + $0x10] sm:$0xff]  ;;  %v186_v3 = vmax.f32 %v1065_v0, %v1068_v1  ;;  %v1079_v5 = vld [vmem:[%s1058_s29 + $0x38] sm:$0xff]  ;;  %v1082_v6 = vld [vmem:[%s1058_s29 + $0x40] sm:$0xff]  ;;  %s585_s25 = sshll.u32 %s1453_s16, 4  ;;  %s571_s30 = scalar_lea.sflag [#allocation4], %s1052_s22  ;;  %s1552_s25 = int_to_ptr.vmem [resolvable:$true] %s585_s25 }
  0x37   : > { %v1076_v4 = vld [vmem:[%s1058_s29 + $0x30] sm:$0xff]  ;;  %v1087_v8 = vld [vmem:[%s1058_s29 + $0x18] sm:$0xff]  ;;  %v1090_v9 = vld [vmem:[%s1058_s29 + $0x20] sm:$0xff]  ;;  %s1547_s28 = scalar_lea.hbm %s1598_s1, %s673_s24  ;;  %s880_s2 = scalar_lea.vmem %s1552_s25, 6144 }
  0x38   : > { %v194_v7 = vmax.f32 %v1076_v4, %v1079_v5  ;;  %v1093_v10 = vld [vmem:[%s1058_s29 + $0x28] sm:$0xff]  ;;  %v187_v11 = vmax.f32 %v186_v3, %v1071_v2  ;;  %v190_v12 = vmax.f32 %v1087_v8, %v1090_v9  ;;  %v1102_v14 = vld [vmem:[%s1058_s29 + $0x50] sm:$0xff]  ;;  %v1105_v15 = vld [vmem:[%s1058_s29 + $0x58] sm:$0xff]  ;;  %p881_p10 = scmp.ne.s32.totalorder %s1552_s25, %s880_s2  ;;  %p1606_p11 = scmp.ne.s32.totalorder %s1602_s17, 0 }
  0x39   : > { %v1099_v13 = vld [vmem:[%s1058_s29 + $0x48] sm:$0xff]  ;;  %v1111_v18 = vld [vmem:[%s1058_s29 + $0x60] sm:$0xff]  ;;  %v1120_v22 = vld [vmem:[%s1058_s29 + $0x78] sm:$0xff]  ;;  %s949_s3 = smov [#allocation5]  }
  0x3a   : > { %v195_v16 = vmax.f32 %v194_v7, %v1082_v6  ;;  %v198_v17 = vmax.f32 %v1099_v13, %v1102_v14  ;;  %v1114_v19 = vld [vmem:[%s1058_s29 + $0x68] sm:$0xff]  ;;  %188 = vmax.xlane.f32.xlu0 %v187_v11  ;;  %v191_v20 = vmax.f32 %v190_v12, %v1093_v10  ;;  %v1123_v23 = vld [vmem:[%s1058_s29 + $0x80] sm:$0xff]  ;;  %v1127_v25 = vld [vmem:[%s1058_s29 + $0x70] sm:$0xff]  ;;  %p882_p12 = pnand %p881_p10, %p1606_p11  ;;  %s884_s4 = sshll.u32 %s949_s3, 4  ;;  %s885_s4 = int_to_ptr.vmem [resolvable:$false] %s884_s4 }
  0x3b   : > { %v202_v21 = vmax.f32 %v1111_v18, %v1114_v19  ;;  %v206_v26 = vmax.f32 %v1120_v22, %v1123_v23  ;;  %v1132_v27 = vld [vmem:[%s1058_s29 + $0x90] sm:$0xff]  ;;  %v1135_v28 = vld [vmem:[%s1058_s29 + $0x98] sm:$0xff]  ;;  %v1138_v29 = vld [vmem:[%s1058_s29 + $0x88] sm:$0xff]  ;;  %s886_s5 = scalar_lea.vmem %s885_s4, 12288  ;;  %p887_p5 = scmp.lt.s32.totalorder %s1552_s25, %s885_s4 }
  0x3c   : > { %196 = vmax.xlane.f32.xlu1 %v195_v16  ;;  %v199_v24 = vmax.f32 %v198_v17, %v1105_v15  ;;  %v1141_v30 = vld [vmem:[%s1058_s29 + $0xa8] sm:$0xff]  ;;  %v1144_v31 = vld [vmem:[%s1058_s29 + $0xb0] sm:$0xff]  ;;  %v210_v33 = vmax.f32 %v1132_v27, %v1135_v28  ;;  %v1151_v35 = vld [vmem:[%s1058_s29 + $0xa0] sm:$0xff]  ;;  %p883_p4 = pneg %p882_p12  ;;  %p888_p7 = scmp.lt.s32.totalorder %s886_s5, %s880_s2 }
  0x3d   : > { %v203_v32 = vmax.f32 %v202_v21, %v1127_v25  ;;  %v207_v34 = vmax.f32 %v206_v26, %v1138_v29  ;;  %v214_v36 = vmax.f32 %v1141_v30, %v1144_v31  ;;  %v1156_v37 = vld [vmem:[%s1058_s29 + $0xc0] sm:$0xff]  ;;  %v1159_v38 = vld [vmem:[%s1058_s29 + $0xc8] sm:$0xff]  ;;  %v1162_v39 = vld [vmem:[%s1058_s29 + $0xb8] sm:$0xff] }
  0x3e   : > { %192 = vmax.xlane.f32.xlu0 %v191_v20  ;;  %v1165_v40 = vld [vmem:[%s1058_s29 + $0xd8] sm:$0xff]  ;;  %v1168_v41 = vld [vmem:[%s1058_s29 + $0xe0] sm:$0xff]  ;;  %v211_v42 = vmax.f32 %v210_v33, %v1151_v35  ;;  %v218_v43 = vmax.f32 %v1156_v37, %v1159_v38  ;;  %v1175_v45 = vld [vmem:[%s1058_s29 + $0xd0] sm:$0xff]  ;;  %p889_p8 = por %p888_p7, %p887_p5 }
  0x3f   : > { %v215_v44 = vmax.f32 %v214_v36, %v1162_v39  ;;  %v222_v46 = vmax.f32 %v1165_v40, %v1168_v41  ;;  %v1180_v47 = vld [vmem:[%s1058_s29 + $0xf0] sm:$0xff]  ;;  %v1183_v48 = vld [vmem:[%s1058_s29 + $0xf8] sm:$0xff]  ;;  %v1186_v49 = vld [vmem:[%s1058_s29 + $0xe8] sm:$0xff] }
  0x40   : > { %200 = vmax.xlane.f32.xlu1 %v199_v24  ;;  %v1189_v50 = vld [vmem:[%s1058_s29 + $0x108] sm:$0xff]  ;;  %v1192_v51 = vld [vmem:[%s1058_s29 + $0x110] sm:$0xff]  ;;  %v219_v52 = vmax.f32 %v218_v43, %v1175_v45  ;;  %v226_v53 = vmax.f32 %v1180_v47, %v1183_v48  ;;  %v1199_v55 = vld [vmem:[%s1058_s29 + $0x100] sm:$0xff]  ;;  %p890_p9 = pnand %p889_p8, %p883_p4 }
  0x41   : > { %v223_v54 = vmax.f32 %v222_v46, %v1186_v49  ;;  %v230_v56 = vmax.f32 %v1189_v50, %v1192_v51  ;;  %v1204_v57 = vld [vmem:[%s1058_s29 + $0x120] sm:$0xff]  ;;  %v1207_v58 = vld [vmem:[%s1058_s29 + $0x128] sm:$0xff]  ;;  %v1210_v59 = vld [vmem:[%s1058_s29 + $0x118] sm:$0xff] }
  0x42   : > { %204 = vmax.xlane.f32.xlu0 %v203_v32  ;;  %v1213_v60 = vld [vmem:[%s1058_s29 + $0x138] sm:$0xff]  ;;  %v1216_v61 = vld [vmem:[%s1058_s29 + $0x140] sm:$0xff]  ;;  %v227_v62 = vmax.f32 %v226_v53, %v1199_v55  ;;  %v234_v63 = vmax.f32 %v1204_v57, %v1207_v58  ;;  %v1223_v7 = vld [vmem:[%s1058_s29 + $0x130] sm:$0xff] }
  0x43   : > { %v231_v3 = vmax.f32 %v230_v56, %v1210_v59  ;;  %v238_v11 = vmax.f32 %v1213_v60, %v1216_v61  ;;  %v1228_v12 = vld [vmem:[%s1058_s29 + $0x150] sm:$0xff]  ;;  %v1231_v16 = vld [vmem:[%s1058_s29 + $0x158] sm:$0xff]  ;;  %v1234_v17 = vld [vmem:[%s1058_s29 + $0x148] sm:$0xff] }
  0x44   : > { %208 = vmax.xlane.f32.xlu1 %v207_v34  ;;  %v1237_v20 = vld [vmem:[%s1058_s29 + $0x168] sm:$0xff]  ;;  %v1240_v21 = vld [vmem:[%s1058_s29 + $0x170] sm:$0xff]  ;;  %v235_v24 = vmax.f32 %v234_v63, %v1223_v7  ;;  %v242_v26 = vmax.f32 %v1228_v12, %v1231_v16  ;;  %v1247_v33 = vld [vmem:[%s1058_s29 + $0x160] sm:$0xff] }
  0x45   : > { %v239_v32 = vmax.f32 %v238_v11, %v1234_v17  ;;  %v246_v34 = vmax.f32 %v1237_v20, %v1240_v21  ;;  %v1252_v36 = vld [vmem:[%s1058_s29 + $0x178] sm:$0xff] }
  0x46   : > { %212 = vmax.xlane.f32.xlu0 %v211_v42  ;;  %v243_v42 = vmax.f32 %v242_v26, %v1247_v33 }
  0x47   : > { %v247_v43 = vmax.f32 %v246_v34, %v1252_v36 }
  0x48   : > { %216 = vmax.xlane.f32.xlu1 %v215_v44 }
  0x4a   : > { %220 = vmax.xlane.f32.xlu0 %v219_v52 }
  0x4c   : > { %224 = vmax.xlane.f32.xlu1 %v223_v54 }
  0x4e   : > { %228 = vmax.xlane.f32.xlu0 %v227_v62 }
  0x50   : > { %232 = vmax.xlane.f32.xlu1 %v231_v3 }
  0x52   : > { %236 = vmax.xlane.f32.xlu0 %v235_v24 }
  0x54   : > { %240 = vmax.xlane.f32.xlu1 %v239_v32 }
  0x56   : > { %244 = vmax.xlane.f32.xlu0 %v243_v42 }
  0x58   : > { %248 = vmax.xlane.f32.xlu1 %v247_v43 }
  0xc3   : > { %v189_v44 = vpop.xlane.xlu0 %188 }
  0xc4   : > { %v250_v46 = vsub.f32 %v1065_v0, %v189_v44  ;;  %v251_v52 = vsub.f32 %v1068_v1, %v189_v44  ;;  %v252_v53 = vsub.f32 %v1071_v2, %v189_v44 }
  0xc5   : > { %v197_v54 = vpop.xlane.xlu1 %196 }
  0xc6   : > { %v256_v56 = vsub.f32 %v1076_v4, %v197_v54  ;;  %v257_v62 = vsub.f32 %v1079_v5, %v197_v54  ;;  %v258_v63 = vsub.f32 %v1082_v6, %v197_v54  ;;  %v298_v3 = vmul.f32 1.442695, %v250_v46 }
  0xc7   : > { %v300_v11 = vmul.f32 1.442695, %v251_v52  ;;  %v302_v24 = vmul.f32 1.442695, %v252_v53  ;;  %v193_v34 = vpop.xlane.xlu0 %192 }
  0xc8   : > { %v310_v26 = vmul.f32 1.442695, %v256_v56  ;;  %v312_v32 = vmul.f32 1.442695, %v257_v62  ;;  %724 = vpow2.f32 %v298_v3  ;;  %v253_v0 = vsub.f32 %v1087_v8, %v193_v34 }
  0xc9   : > { %v254_v1 = vsub.f32 %v1090_v9, %v193_v34  ;;  %v255_v2 = vsub.f32 %v1093_v10, %v193_v34  ;;  %v201_v42 = vpop.xlane.xlu1 %200  ;;  %726 = vpow2.f32 %v300_v11  ;;  %v314_v4 = vmul.f32 1.442695, %v258_v63 }
  0xca   : > { %v259_v5 = vsub.f32 %v1099_v13, %v201_v42  ;;  %728 = vpow2.f32 %v302_v24  ;;  %v304_v6 = vmul.f32 1.442695, %v253_v0  ;;  %v260_v43 = vsub.f32 %v1102_v14, %v201_v42 }
  0xcb   : > { %730 = vpow2.f32 %v310_v26  ;;  %v306_v44 = vmul.f32 1.442695, %v254_v1  ;;  %v261_v46 = vsub.f32 %v1105_v15, %v201_v42  ;;  %v205_v52 = vpop.xlane.xlu0 %204  ;;  %v308_v8 = vmul.f32 1.442695, %v255_v2 }
  0xcc   : > { %732 = vpow2.f32 %v312_v32  ;;  %v262_v9 = vsub.f32 %v1111_v18, %v205_v52  ;;  %v316_v10 = vmul.f32 1.442695, %v259_v5  ;;  %v263_v54 = vsub.f32 %v1114_v19, %v205_v52 }
  0xcd   : > { %v209_v53 = vpop.xlane.xlu1 %208  ;;  %734 = vpow2.f32 %v314_v4  ;;  %v318_v13 = vmul.f32 1.442695, %v260_v43  ;;  %v264_v56 = vsub.f32 %v1127_v25, %v205_v52  ;;  %v320_v14 = vmul.f32 1.442695, %v261_v46 }
  0xce   : > { %736 = vpow2.f32 %v304_v6  ;;  %v265_v62 = vsub.f32 %v1120_v22, %v209_v53  ;;  %v322_v15 = vmul.f32 1.442695, %v262_v9  ;;  %v266_v3 = vsub.f32 %v1123_v23, %v209_v53 }
  0xcf   : > { %738 = vpow2.f32 %v306_v44  ;;  %v213_v63 = vpop.xlane.xlu0 %212  ;;  %v324_v18 = vmul.f32 1.442695, %v263_v54  ;;  %v267_v24 = vsub.f32 %v1138_v29, %v209_v53  ;;  %v326_v19 = vmul.f32 1.442695, %v264_v56 }
  0xd0   : > { %740 = vpow2.f32 %v308_v8  ;;  %v268_v26 = vsub.f32 %v1132_v27, %v213_v63  ;;  %v328_v25 = vmul.f32 1.442695, %v265_v62  ;;  %v269_v32 = vsub.f32 %v1135_v28, %v213_v63 }
  0xd1   : > { %v217_v11 = vpop.xlane.xlu1 %216  ;;  %742 = vpow2.f32 %v316_v10  ;;  %v330_v22 = vmul.f32 1.442695, %v266_v3  ;;  %v270_v34 = vsub.f32 %v1151_v35, %v213_v63  ;;  %v332_v1 = vmul.f32 1.442695, %v267_v24 }
  0xd2   : > { %744 = vpow2.f32 %v318_v13  ;;  %v271_v0 = vsub.f32 %v1141_v30, %v217_v11  ;;  %v334_v42 = vmul.f32 1.442695, %v268_v26  ;;  %v272_v27 = vsub.f32 %v1144_v31, %v217_v11 }
  0xd3   : > { %746 = vpow2.f32 %v320_v14  ;;  %v221_v2 = vpop.xlane.xlu0 %220  ;;  %v336_v28 = vmul.f32 1.442695, %v269_v32  ;;  %v273_v35 = vsub.f32 %v1162_v39, %v217_v11  ;;  %v338_v30 = vmul.f32 1.442695, %v270_v34 }
  0xd4   : > { %748 = vpow2.f32 %v322_v15  ;;  %v340_v43 = vmul.f32 1.442695, %v271_v0  ;;  %v274_v44 = vsub.f32 %v1156_v37, %v221_v2  ;;  %v275_v52 = vsub.f32 %v1159_v38, %v221_v2 }
  0xd5   : > { %v1278_v23 = vpop.eup %724  ;;  %750 = vpow2.f32 %v324_v18  ;;  %v225_v4 = vpop.xlane.xlu1 %224  ;;  %v276_v31 = vsub.f32 %v1175_v45, %v221_v2  ;;  %v342_v39 = vmul.f32 1.442695, %v272_v27  ;;  %v344_v54 = vmul.f32 1.442695, %v273_v35 }
  0xd6   : > { %v1280_v29 = vpop.eup %726  ;;  %752 = vpow2.f32 %v326_v19  ;;  %v277_v8 = vsub.f32 %v1165_v40, %v225_v4  ;;  %v278_v53 = vsub.f32 %v1168_v41, %v225_v4  ;;  %v346_v56 = vmul.f32 1.442695, %v274_v44 }
  0xd7   : > { %v1283_v5 = vpop.eup %728  ;;  %754 = vpow2.f32 %v328_v25  ;;  %v229_v37 = vpop.xlane.xlu0 %228  ;;  %v279_v38 = vsub.f32 %v1186_v49, %v225_v4  ;;  %v394_v40 = vadd.f32 %v1280_v29, %v1278_v23  ;;  %v348_v62 = vmul.f32 1.442695, %v275_v52 }
  0xd8   : > { %v1286_v6 = vpop.eup %730  ;;  %756 = vpow2.f32 %v330_v22  ;;  %v350_v41 = vmul.f32 1.442695, %v276_v31  ;;  %v352_v63 = vmul.f32 1.442695, %v277_v8  ;;  %v354_v3 = vmul.f32 1.442695, %v278_v53 }
  0xd9   : > { %v1289_v46 = vpop.eup %732  ;;  %758 = vpow2.f32 %v332_v1  ;;  %v233_v45 = vpop.xlane.xlu1 %232  ;;  %v280_v11 = vsub.f32 %v1180_v47, %v229_v37  ;;  %v395_v18 = vadd.f32 %v1283_v5, %v394_v40  ;;  %v281_v49 = vsub.f32 %v1183_v48, %v229_v37 }
  0xda   : > { %v1294_v9 = vpop.eup %734  ;;  %760 = vpow2.f32 %v334_v42  ;;  %v282_v19 = vsub.f32 %v1199_v55, %v229_v37  ;;  %v283_v26 = vsub.f32 %v1189_v50, %v233_v45  ;;  %v284_v32 = vsub.f32 %v1192_v51, %v233_v45 }
  0xdb   : > { %v1297_v10 = vpop.eup %736  ;;  %762 = vpow2.f32 %v336_v28  ;;  %396 = vadd.xlane.f32.xlu0 %v395_v18  ;;  %v402_v47 = vadd.f32 %v1289_v46, %v1286_v6  ;;  %v356_v48 = vmul.f32 1.442695, %v279_v38  ;;  %v285_v55 = vsub.f32 %v1210_v59, %v233_v45  ;;  %v237_v0 = vpop.xlane.xlu0 %236 }
  0xdc   : > { %v1299_v13 = vpop.eup %738  ;;  %764 = vpow2.f32 %v338_v30  ;;  %v358_v1 = vmul.f32 1.442695, %v280_v11  ;;  %v360_v27 = vmul.f32 1.442695, %v281_v49  ;;  %v362_v4 = vmul.f32 1.442695, %v282_v19 }
  0xdd   : > { %v1304_v14 = vpop.eup %740  ;;  %766 = vpow2.f32 %v340_v43  ;;  %v398_v22 = vadd.f32 %v1299_v13, %v1297_v10  ;;  %v403_v51 = vadd.f32 %v1294_v9, %v402_v47  ;;  %v241_v28 = vpop.xlane.xlu1 %240  ;;  %v364_v30 = vmul.f32 1.442695, %v283_v26 }
  0xde   : > { %v1306_v15 = vpop.eup %742  ;;  %768 = vpow2.f32 %v342_v39  ;;  %v366_v59 = vmul.f32 1.442695, %v284_v32  ;;  %v286_v43 = vsub.f32 %v1204_v57, %v237_v0  ;;  %v287_v52 = vsub.f32 %v1207_v58, %v237_v0 }
  0xdf   : > { %v1310_v24 = vpop.eup %744  ;;  %770 = vpow2.f32 %v344_v54  ;;  %v399_v2 = vadd.f32 %v1304_v14, %v398_v22  ;;  %404 = vadd.xlane.f32.xlu0 %v403_v51  ;;  %v368_v53 = vmul.f32 1.442695, %v285_v55  ;;  %v288_v54 = vsub.f32 %v1223_v7, %v237_v0 }
  0xe0   : > { %v1315_v25 = vpop.eup %746  ;;  %772 = vpow2.f32 %v346_v56  ;;  %v406_v31 = vadd.f32 %v1310_v24, %v1306_v15  ;;  %v289_v57 = vsub.f32 %v1213_v60, %v241_v28  ;;  %v245_v56 = vpop.xlane.xlu0 %244  ;;  %v372_v60 = vmul.f32 1.442695, %v287_v52 }
  0xe1   : > { %v1322_v34 = vpop.eup %748  ;;  %774 = vpow2.f32 %v348_v62  ;;  %400 = vadd.xlane.f32.xlu1 %v399_v2  ;;  %v370_v62 = vmul.f32 1.442695, %v286_v43  ;;  %v374_v18 = vmul.f32 1.442695, %v288_v54  ;;  %v292_v49 = vsub.f32 %v1228_v12, %v245_v56 }
  0xe2   : > { %v1325_v50 = vpop.eup %750  ;;  %776 = vpow2.f32 %v350_v41  ;;  %v407_v58 = vadd.f32 %v1315_v25, %v406_v31  ;;  %v290_v41 = vsub.f32 %v1216_v61, %v241_v28  ;;  %v293_v19 = vsub.f32 %v1231_v16, %v245_v56  ;;  %v249_v61 = vpop.xlane.xlu1 %248 }
  0xe3   : > { %v1329_v42 = vpop.eup %752  ;;  %778 = vpow2.f32 %v352_v63  ;;  %v410_v8 = vadd.f32 %v1325_v50, %v1322_v34  ;;  %v291_v63 = vsub.f32 %v1234_v17, %v241_v28  ;;  %v376_v32 = vmul.f32 1.442695, %v289_v57 }
  0xe4   : > { %v1331_v35 = vpop.eup %754  ;;  %780 = vpow2.f32 %v354_v3  ;;  %v294_v55 = vsub.f32 %v1247_v33, %v245_v56  ;;  %v382_v2 = vmul.f32 1.442695, %v292_v49  ;;  %v297_v33 = vsub.f32 %v1252_v36, %v249_v61 }
  0xe5   : > { %v1334_v44 = vpop.eup %756  ;;  %782 = vpow2.f32 %v356_v48  ;;  %v411_v38 = vadd.f32 %v1329_v42, %v410_v8  ;;  %408 = vadd.xlane.f32.xlu1 %v407_v58  ;;  %v378_v48 = vmul.f32 1.442695, %v290_v41  ;;  %v380_v16 = vmul.f32 1.442695, %v291_v63 }
  0xe6   : > { %v1341_v39 = vpop.eup %758  ;;  %784 = vpow2.f32 %v358_v1  ;;  %v414_v45 = vadd.f32 %v1334_v44, %v1331_v35  ;;  %v295_v1 = vsub.f32 %v1237_v20, %v249_v61  ;;  %v386_v43 = vmul.f32 1.442695, %v294_v55 }
  0xe7   : > { %v1345_v37 = vpop.eup %760  ;;  %786 = vpow2.f32 %v360_v27  ;;  %412 = vadd.xlane.f32.xlu0 %v411_v38  ;;  %v384_v27 = vmul.f32 1.442695, %v293_v19  ;;  %v392_v57 = vmul.f32 1.442695, %v297_v33 }
  0xe8   : > { %v1351_v40 = vpop.eup %762  ;;  %788 = vpow2.f32 %v362_v4  ;;  %v415_v17 = vadd.f32 %v1341_v39, %v414_v45  ;;  %v296_v4 = vsub.f32 %v1240_v21, %v249_v61  ;;  %v388_v31 = vmul.f32 1.442695, %v295_v1 }
  0xe9   : > { %v1354_v7 = vpop.eup %764  ;;  %790 = vpow2.f32 %v364_v30  ;;  %v418_v3 = vadd.f32 %v1351_v40, %v1345_v37 }
  0xea   : > { %v1359_v11 = vpop.eup %766  ;;  %792 = vpow2.f32 %v366_v59  ;;  %416 = vadd.xlane.f32.xlu1 %v415_v17  ;;  %v390_v36 = vmul.f32 1.442695, %v296_v4 }
  0xeb   : > { %v1363_v26 = vpop.eup %768  ;;  %794 = vpow2.f32 %v368_v53  ;;  %v419_v47 = vadd.f32 %v1354_v7, %v418_v3 }
  0xec   : > { %v1367_v22 = vpop.eup %770  ;;  %796 = vpow2.f32 %v370_v62  ;;  %v422_v12 = vadd.f32 %v1363_v26, %v1359_v11 }
  0xed   : > { %v1372_v0 = vpop.eup %772  ;;  %798 = vpow2.f32 %v372_v60  ;;  %420 = vadd.xlane.f32.xlu0 %v419_v47 }
  0xee   : > { %v1375_v51 = vpop.eup %774  ;;  %800 = vpow2.f32 %v374_v18  ;;  %v423_v30 = vadd.f32 %v1367_v22, %v422_v12 }
  0xef   : > { %v1378_v28 = vpop.eup %776  ;;  %802 = vpow2.f32 %v376_v32  ;;  %v426_v59 = vadd.f32 %v1375_v51, %v1372_v0 }
  0xf0   : > { %v1384_v20 = vpop.eup %778  ;;  %804 = vpow2.f32 %v378_v48  ;;  %424 = vadd.xlane.f32.xlu1 %v423_v30 }
  0xf1   : > { %v1386_v52 = vpop.eup %780  ;;  %806 = vpow2.f32 %v380_v16  ;;  %v427_v21 = vadd.f32 %v1378_v28, %v426_v59 }
  0xf2   : > { %v1389_v8 = vpop.eup %782  ;;  %808 = vpow2.f32 %v382_v2  ;;  %v430_v53 = vadd.f32 %v1386_v52, %v1384_v20 }
  0xf3   : > { %v1393_v54 = vpop.eup %784  ;;  %810 = vpow2.f32 %v384_v27  ;;  %428 = vadd.xlane.f32.xlu0 %v427_v21 }
  0xf4   : > { %v1395_v56 = vpop.eup %786  ;;  %812 = vpow2.f32 %v386_v43  ;;  %v431_v58 = vadd.f32 %v1389_v8, %v430_v53 }
  0xf5   : > { %v1398_v38 = vpop.eup %788  ;;  %814 = vpow2.f32 %v388_v31  ;;  %v434_v45 = vadd.f32 %v1395_v56, %v1393_v54 }
  0xf6   : > { %v1402_v62 = vpop.eup %790  ;;  %816 = vpow2.f32 %v390_v36  ;;  %432 = vadd.xlane.f32.xlu1 %v431_v58 }
  0xf7   : > { %v1404_v41 = vpop.eup %792  ;;  %818 = vpow2.f32 %v392_v57  ;;  %v435_v60 = vadd.f32 %v1398_v38, %v434_v45 }
  0xf8   : > { %v1407_v63 = vpop.eup %794  ;;  %v438_v3 = vadd.f32 %v1404_v41, %v1402_v62 }
  0xf9   : > { %v1411_v18 = vpop.eup %796  ;;  %436 = vadd.xlane.f32.xlu0 %v435_v60 }
  0xfa   : > { %v1413_v49 = vpop.eup %798  ;;  %v439_v19 = vadd.f32 %v1407_v63, %v438_v3 }
  0xfb   : > { %v1416_v61 = vpop.eup %800  ;;  %v442_v32 = vadd.f32 %v1413_v49, %v1411_v18 }
  0xfc   : > { %v1420_v17 = vpop.eup %802  ;;  %440 = vadd.xlane.f32.xlu1 %v439_v19 }
  0xfd   : > { %v1422_v47 = vpop.eup %804  ;;  %v443_v48 = vadd.f32 %v1416_v61, %v442_v32 }
  0xfe   : > { %v1425_v55 = vpop.eup %806  ;;  %v446_v12 = vadd.f32 %v1422_v47, %v1420_v17 }
  0xff   : > { %v1429_v16 = vpop.eup %808  ;;  %444 = vadd.xlane.f32.xlu0 %v443_v48 }
 0x100   : > { %v1431_v1 = vpop.eup %810  ;;  %v447_v2 = vadd.f32 %v1425_v55, %v446_v12 }
 0x101   : > { %v1434_v27 = vpop.eup %812  ;;  %v450_v4 = vadd.f32 %v1431_v1, %v1429_v16 }
 0x102   : > { %v1438_v33 = vpop.eup %814  ;;  %448 = vadd.xlane.f32.xlu1 %v447_v2 }
 0x103   : > { %v1440_v30 = vpop.eup %816  ;;  %v451_v59 = vadd.f32 %v1434_v27, %v450_v4 }
 0x104   : > { %v1443_v43 = vpop.eup %818  ;;  %v454_v31 = vadd.f32 %v1440_v30, %v1438_v33 }
 0x105   : > { %452 = vadd.xlane.f32.xlu0 %v451_v59 }
 0x106   : > { %v455_v21 = vadd.f32 %v1443_v43, %v454_v31 }
 0x108   : > { %456 = vadd.xlane.f32.xlu1 %v455_v21 }
 0x164   : > { %v397_v36 = vpop.xlane.xlu0 %396 }
 0x165   : > { %820 = vrcp.f32 %v397_v36 }
 0x168   : > { %v405_v57 = vpop.xlane.xlu0 %404 }
 0x16a   : > { %v401_v53 = vpop.xlane.xlu1 %400 }
 0x16b   : > { %822 = vrcp.f32 %v401_v53 }
 0x16c   : > { %824 = vrcp.f32 %v405_v57 }
 0x16e   : > { %v409_v58 = vpop.xlane.xlu1 %408 }
 0x16f   : > { %826 = vrcp.f32 %v409_v58 }
 0x170   : > { %v413_v45 = vpop.xlane.xlu0 %412 }
 0x171   : > { %828 = vrcp.f32 %v413_v45 }
 0x172   : > { %v821_v19 = vpop.eup %820 }
 0x173   : > { %v417_v60 = vpop.xlane.xlu1 %416  ;;  %v459_v32 = vmul.f32 %v821_v19, %v1278_v23  ;;  %v460_v48 = vmul.f32 %v821_v19, %v1280_v29  ;;  %v461_v12 = vmul.f32 %v821_v19, %v1283_v5 }
 0x174   : > { %830 = vrcp.f32 %v417_v60 }
 0x175   : > { %522 = vst [vmem:[%s1453_s16] sm:$0xff] %v459_v32  ;;  %523 = vst [vmem:[%s1453_s16 + $0x8] sm:$0xff] %v460_v48 }
 0x176   : > { %v421_v3 = vpop.xlane.xlu0 %420  ;;  %524 = vst [vmem:[%s1453_s16 + $0x10] sm:$0xff] %v461_v12 }
 0x177   : > { %832 = vrcp.f32 %v421_v3 }
 0x178   : > { %v823_v23 = vpop.eup %822 }
 0x179   : > { %v425_v2 = vpop.xlane.xlu1 %424  ;;  %v825_v29 = vpop.eup %824  ;;  %v463_v5 = vmul.f32 %v823_v23, %v1297_v10  ;;  %v464_v4 = vmul.f32 %v823_v23, %v1299_v13  ;;  %v465_v59 = vmul.f32 %v823_v23, %v1304_v14 }
 0x17a   : > { %834 = vrcp.f32 %v425_v2  ;;  %v467_v21 = vmul.f32 %v825_v29, %v1286_v6  ;;  %v468_v36 = vmul.f32 %v825_v29, %v1289_v46  ;;  %v469_v53 = vmul.f32 %v825_v29, %v1294_v9 }
 0x17b   : > { %525 = vst [vmem:[%s1453_s16 + $0x18] sm:$0xff] %v463_v5  ;;  %526 = vst [vmem:[%s1453_s16 + $0x20] sm:$0xff] %v464_v4 }
 0x17c   : > { %v429_v31 = vpop.xlane.xlu0 %428  ;;  %527 = vst [vmem:[%s1453_s16 + $0x28] sm:$0xff] %v465_v59  ;;  %528 = vst [vmem:[%s1453_s16 + $0x30] sm:$0xff] %v467_v21  ;;  %v827_v13 = vpop.eup %826 }
 0x17d   : > { %836 = vrcp.f32 %v429_v31  ;;  %529 = vst [vmem:[%s1453_s16 + $0x38] sm:$0xff] %v468_v36  ;;  %530 = vst [vmem:[%s1453_s16 + $0x40] sm:$0xff] %v469_v53  ;;  %v471_v46 = vmul.f32 %v827_v13, %v1306_v15  ;;  %v472_v9 = vmul.f32 %v827_v13, %v1310_v24  ;;  %v473_v14 = vmul.f32 %v827_v13, %v1315_v25 }
 0x17e   : > { %v829_v6 = vpop.eup %828 }
 0x17f   : > { %v433_v10 = vpop.xlane.xlu1 %432  ;;  %v475_v57 = vmul.f32 %v829_v6, %v1322_v34  ;;  %v476_v58 = vmul.f32 %v829_v6, %v1325_v50  ;;  %v477_v45 = vmul.f32 %v829_v6, %v1329_v42  ;;  %531 = vst [vmem:[%s1453_s16 + $0x48] sm:$0xff] %v471_v46  ;;  %532 = vst [vmem:[%s1453_s16 + $0x50] sm:$0xff] %v472_v9 }
 0x180   : > { %838 = vrcp.f32 %v433_v10  ;;  %533 = vst [vmem:[%s1453_s16 + $0x58] sm:$0xff] %v473_v14 }
 0x181   : > { %v831_v3 = vpop.eup %830  ;;  %534 = vst [vmem:[%s1453_s16 + $0x60] sm:$0xff] %v475_v57  ;;  %535 = vst [vmem:[%s1453_s16 + $0x68] sm:$0xff] %v476_v58 }
 0x182   : > { %v437_v60 = vpop.xlane.xlu0 %436  ;;  %536 = vst [vmem:[%s1453_s16 + $0x70] sm:$0xff] %v477_v45  ;;  %v479_v24 = vmul.f32 %v831_v3, %v1331_v35  ;;  %v480_v25 = vmul.f32 %v831_v3, %v1334_v44  ;;  %v481_v34 = vmul.f32 %v831_v3, %v1341_v39 }
 0x183   : > { %840 = vrcp.f32 %v437_v60 }
 0x184   : > { %v833_v15 = vpop.eup %832  ;;  %537 = vst [vmem:[%s1453_s16 + $0x78] sm:$0xff] %v479_v24  ;;  %538 = vst [vmem:[%s1453_s16 + $0x80] sm:$0xff] %v480_v25 }
 0x185   : > { %v441_v50 = vpop.xlane.xlu1 %440  ;;  %v483_v42 = vmul.f32 %v833_v15, %v1345_v37  ;;  %v484_v19 = vmul.f32 %v833_v15, %v1351_v40  ;;  %v485_v32 = vmul.f32 %v833_v15, %v1354_v7  ;;  %539 = vst [vmem:[%s1453_s16 + $0x88] sm:$0xff] %v481_v34 }
 0x186   : > { %842 = vrcp.f32 %v441_v50 }
 0x187   : > { %v835_v48 = vpop.eup %834  ;;  %540 = vst [vmem:[%s1453_s16 + $0x90] sm:$0xff] %v483_v42  ;;  %541 = vst [vmem:[%s1453_s16 + $0x98] sm:$0xff] %v484_v19 }
 0x188   : > { %542 = vst [vmem:[%s1453_s16 + $0xa0] sm:$0xff] %v485_v32  ;;  %v445_v35 = vpop.xlane.xlu0 %444  ;;  %v487_v44 = vmul.f32 %v835_v48, %v1359_v11  ;;  %v488_v39 = vmul.f32 %v835_v48, %v1363_v26  ;;  %v489_v37 = vmul.f32 %v835_v48, %v1367_v22 }
 0x189   : > { %844 = vrcp.f32 %v445_v35 }
 0x18a   : > { %v837_v40 = vpop.eup %836  ;;  %543 = vst [vmem:[%s1453_s16 + $0xa8] sm:$0xff] %v487_v44  ;;  %544 = vst [vmem:[%s1453_s16 + $0xb0] sm:$0xff] %v488_v39 }
 0x18b   : > { %545 = vst [vmem:[%s1453_s16 + $0xb8] sm:$0xff] %v489_v37  ;;  %v491_v7 = vmul.f32 %v837_v40, %v1372_v0  ;;  %v492_v12 = vmul.f32 %v837_v40, %v1375_v51  ;;  %v493_v2 = vmul.f32 %v837_v40, %v1378_v28  ;;  %v449_v11 = vpop.xlane.xlu1 %448 }
 0x18c   : > { %846 = vrcp.f32 %v449_v11 }
 0x18d   : > { %v839_v23 = vpop.eup %838  ;;  %546 = vst [vmem:[%s1453_s16 + $0xc0] sm:$0xff] %v491_v7  ;;  %547 = vst [vmem:[%s1453_s16 + $0xc8] sm:$0xff] %v492_v12 }
 0x18e   : > { %548 = vst [vmem:[%s1453_s16 + $0xd0] sm:$0xff] %v493_v2  ;;  %v495_v26 = vmul.f32 %v839_v23, %v1384_v20  ;;  %v496_v22 = vmul.f32 %v839_v23, %v1386_v52  ;;  %v497_v0 = vmul.f32 %v839_v23, %v1389_v8  ;;  %v453_v29 = vpop.xlane.xlu0 %452 }
 0x18f   : > { %848 = vrcp.f32 %v453_v29 }
 0x190   : > { %v841_v51 = vpop.eup %840  ;;  %549 = vst [vmem:[%s1453_s16 + $0xd8] sm:$0xff] %v495_v26  ;;  %550 = vst [vmem:[%s1453_s16 + $0xe0] sm:$0xff] %v496_v22 }
 0x191   : > { %551 = vst [vmem:[%s1453_s16 + $0xe8] sm:$0xff] %v497_v0  ;;  %v499_v28 = vmul.f32 %v841_v51, %v1393_v54  ;;  %v500_v5 = vmul.f32 %v841_v51, %v1395_v56  ;;  %v501_v20 = vmul.f32 %v841_v51, %v1398_v38  ;;  %v457_v4 = vpop.xlane.xlu1 %456 }
 0x192   : > { %850 = vrcp.f32 %v457_v4 }
 0x193   : > { %v843_v52 = vpop.eup %842  ;;  %552 = vst [vmem:[%s1453_s16 + $0xf0] sm:$0xff] %v499_v28  ;;  %553 = vst [vmem:[%s1453_s16 + $0xf8] sm:$0xff] %v500_v5 }
 0x194   : > { %554 = vst [vmem:[%s1453_s16 + $0x100] sm:$0xff] %v501_v20  ;;  %v503_v8 = vmul.f32 %v843_v52, %v1402_v62  ;;  %v504_v59 = vmul.f32 %v843_v52, %v1404_v41  ;;  %v505_v54 = vmul.f32 %v843_v52, %v1407_v63 }
 0x196   : > { %v845_v31 = vpop.eup %844  ;;  %555 = vst [vmem:[%s1453_s16 + $0x108] sm:$0xff] %v503_v8  ;;  %556 = vst [vmem:[%s1453_s16 + $0x110] sm:$0xff] %v504_v59 }
 0x197   : > { %557 = vst [vmem:[%s1453_s16 + $0x118] sm:$0xff] %v505_v54  ;;  %v507_v56 = vmul.f32 %v845_v31, %v1411_v18  ;;  %v508_v38 = vmul.f32 %v845_v31, %v1413_v49  ;;  %v509_v21 = vmul.f32 %v845_v31, %v1416_v61 }
 0x199   : > { %v847_v62 = vpop.eup %846  ;;  %558 = vst [vmem:[%s1453_s16 + $0x120] sm:$0xff] %v507_v56  ;;  %559 = vst [vmem:[%s1453_s16 + $0x128] sm:$0xff] %v508_v38 }
 0x19a   : > { %560 = vst [vmem:[%s1453_s16 + $0x130] sm:$0xff] %v509_v21  ;;  %v511_v41 = vmul.f32 %v847_v62, %v1420_v17  ;;  %v512_v63 = vmul.f32 %v847_v62, %v1422_v47  ;;  %v513_v36 = vmul.f32 %v847_v62, %v1425_v55 }
 0x19c   : > { %v849_v18 = vpop.eup %848  ;;  %561 = vst [vmem:[%s1453_s16 + $0x138] sm:$0xff] %v511_v41  ;;  %562 = vst [vmem:[%s1453_s16 + $0x140] sm:$0xff] %v512_v63 }
 0x19d   : > { %563 = vst [vmem:[%s1453_s16 + $0x148] sm:$0xff] %v513_v36  ;;  %v515_v49 = vmul.f32 %v849_v18, %v1429_v16  ;;  %v516_v61 = vmul.f32 %v849_v18, %v1431_v1  ;;  %v517_v53 = vmul.f32 %v849_v18, %v1434_v27 }
 0x19f   : > { %v851_v17 = vpop.eup %850  ;;  %564 = vst [vmem:[%s1453_s16 + $0x150] sm:$0xff] %v515_v49  ;;  %565 = vst [vmem:[%s1453_s16 + $0x158] sm:$0xff] %v516_v61 }
 0x1a0   : > { %566 = vst [vmem:[%s1453_s16 + $0x160] sm:$0xff] %v517_v53  ;;  %v519_v47 = vmul.f32 %v851_v17, %v1438_v33  ;;  %v520_v55 = vmul.f32 %v851_v17, %v1440_v30  ;;  %v521_v16 = vmul.f32 %v851_v17, %v1443_v43 }
 0x1a2   : > { %567 = vst [vmem:[%s1453_s16 + $0x168] sm:$0xff] %v519_v47  ;;  %568 = vst [vmem:[%s1453_s16 + $0x170] sm:$0xff] %v520_v55 }
 0x1a3   : > { %569 = vst [vmem:[%s1453_s16 + $0x178] sm:$0xff] %v521_v16 }
 0x1a4   : > { %893 = shalt.err (!%p890_p9)
}
 0x1a5   : > { %s894_s11 = scalar_lea.hbm %s1547_s28, 6144  ;;  %s898_s19 = scalar_lea.hbm %s1598_s1, 24576 }
 0x1a6   : > { %p895_p13 = scmp.ne.s32.totalorder %s1547_s28, %s894_s11  ;;  %p899_p2 = scmp.lt.s32.totalorder %s1547_s28, %s1598_s1 }
 0x1a7   : > { %p900_p3 = scmp.lt.s32.totalorder %s898_s19, %s894_s11 }
 0x1a8   : > { %p896_p1 = pnand %p895_p13, %p1606_p11 }
 0x1a9   : > { %p901_p6 = por %p900_p3, %p899_p2 }
 0x1aa   : > { %p897_p0 = pneg %p896_p1 }
 0x1ac   : > { %p902_p10 = pnand %p901_p6, %p897_p0 }
 0x1ae   : > { %905 = shalt.err (!%p902_p10)
}
 0x1af   : > { %s950_s23 = smov 384   ;;  %s951_s26 = smov 24  }
 0x1b0   : > { %676 = dma.vmem_to_hbm [thread:$0]  (%p1606_p11), %s1552_s25, 6144, %s1547_s28, %s571_s30, %s950_s23, %s950_s23, %s951_s26  }
 0x1b1 PF: > { %p687_p12 = scmp.ge.s32.totalorder %s944_s9, 2  ;;  %s600_s29 = sand.u32 1, %s932_s6  }
 0x1b2   : > { %p1607_p4 = scmp.ne.s32.totalorder %s1603_s18, 0  ;;  %s601_s16 = scalar_lea.sflag [#allocation4], %s600_s29 }
 0x1b4   : > { %p683_p5 = pnand %p687_p12, %p1607_p4 }
 0x1b6   : > { %p684_p7 = pneg %p683_p5 }
 0x1b8   : > { %927 = dma.done.wait (%p684_p7), %s601_s16, 6144  }
 0x1b9   : > { %929 = vsyncadd (%p684_p7), %s601_s16, 4294961152  ;;  %p14_p8 = scmp.ge.s32.totalorder %s987_s12, 6   ;;  %s1608_s6 = smov %s936_s7 }
 0x1ba   : > { %s1609_s7 = smov %s940_s8  ;;  %s1610_s8 = smov %s999_s15 }
 0x1bb   : > { %s1611_s9 = smov %s987_s12  ;;  %16 = sbr.rel (!%p14_p8) target bundleno = 5 (0x5), region = 69 }
 0x1c0   :  { %606 = vsyncpa [#allocation3], 1 }
 0x1c1   :  { %608 = vsyncpa [#allocation3 + $0x1], 1 }
 0x1c2   :  { %609 = vsyncpa [#allocation4], 1 }
 0x1c3   :  { %611 = vsyncpa [#allocation4 + $0x1], 1 }

</bundles_post_ra>
